<compile_context>
chip_gen: v6e
topology: v6e:2x2x1
jax: 0.10.0
libtpu: 0.0.40
codegen_flags: <defaults>
</compile_context>

<pallas_src>
import jax
import jax.numpy as jnp
from jax.experimental import pallas as pl
from jax.experimental.pallas import tpu as pltpu


# ----------------------------- kernel ---------------------------------------


def _ffn_kernel(x_ref, w1_ref, b1_ref, w2_ref, b2_ref, o_ref, acc_ref):
    # Grid: (i row tiles [parallel], j d_model column tiles [parallel],
    #        k d_ff chunks [arbitrary, last]).
    # x_ref:   (tm, d_model)  bf16 row tile (resident across j, k)
    # w1_ref:  (d_model, tk)  bf16 W1 chunk (streamed over k)
    # b1_ref:  (1, tk)        f32  b1 chunk
    # w2_ref:  (tk, tn)       bf16 W2 chunk (streamed over k, per column tile j)
    # b2_ref:  (1, tn)        f32
    # o_ref:   (tm, tn)       output tile (resident across k)
    # acc_ref: (tm, tn)       f32 accumulator scratch
    k = pl.program_id(2)

    @pl.when(k == 0)
    def _():
        acc_ref[...] = jnp.zeros_like(acc_ref)

    # First matmul on this d_ff chunk (bf16 operands, f32 accumulation on MXU).
    h = jnp.dot(x_ref[...], w1_ref[...], preferred_element_type=jnp.float32)
    h = jnp.maximum(h + b1_ref[...], 0.0)  # bias + ReLU in f32
    # Dropout is identity in eval mode.
    # TODO(synk): training-mode dropout (pltpu.prng_* stochastic masking) not implemented.

    # Second matmul: fold the chunk straight into the f32 accumulator.
    acc_ref[...] += jnp.dot(h.astype(w2_ref.dtype), w2_ref[...],
                            preferred_element_type=jnp.float32)

    @pl.when(k == pl.num_programs(2) - 1)
    def _():
        o_ref[...] = (acc_ref[...] + b2_ref[...]).astype(o_ref.dtype)


# --------------------------- tile selection ----------------------------------


def _round_up(a, b):
    return (a + b - 1) // b * b


def _vmem_capacity_bytes():
    """Physical VMEM per core; conservative 64 MiB fallback if the query fails."""
    try:
        info = pltpu.get_tpu_info()
        cap = getattr(info, "vmem_capacity_bytes", None)
        if cap:
            return int(cap)
    except Exception:
        pass
    return 64 * 1024 * 1024


def _tile_vmem_bytes(tm, tn, tk, d_model, out_bytes):
    """Estimate of the pipelined working set (inputs/outputs double-buffered)."""
    x_t = tm * d_model * 2 * 2            # bf16 x tile, double-buffered
    w1_t = d_model * tk * 2 * 2           # bf16 W1 chunk, double-buffered
    w2_t = tk * tn * 2 * 2                # bf16 W2 chunk, double-buffered
    b1_t = 8 * tk * 4 * 2                 # (1, tk) f32, padded to 8 sublanes
    b2_t = 8 * tn * 4 * 2
    o_t = tm * tn * out_bytes * 2         # output tile, double-buffered
    acc_t = tm * tn * 4                   # f32 accumulator scratch (single)
    return x_t + w1_t + w2_t + b1_t + b2_t + o_t + acc_t


def _select_tiles(m_pad, d_model, d_ff, out_bytes, vmem_budget, tm_max):
    """Pick (tm, tn, tk) inside the VMEM budget.

    Preference order: full-d_model tn (no W1 re-streaming / h recompute),
    then the largest tk (fewest k steps), then shrink tm only as a last resort.
    """
    tn_cands = [d_model] + [c for c in (4096, 2048, 1024, 512, 256, 128)
                            if c < d_model and d_model % c == 0]
    tk_cands = [c for c in (2048, 1024, 512, 256, 128) if d_ff % c == 0] or [d_ff]

    tm = tm_max if m_pad >= tm_max else m_pad  # m_pad is a multiple of 16
    while True:
        for tn in tn_cands:
            for tk in tk_cands:
                if _tile_vmem_bytes(tm, tn, tk, d_model, out_bytes) <= vmem_budget:
                    return tm, tn, tk
        if tm <= 128:
            # Give up gracefully: smallest config (still correct, just tighter).
            return tm, tn_cands[-1], tk_cands[-1]
        tm = max(128, tm // 2)


# ------------------------------ wrapper --------------------------------------


def feed_forward(x, w1, b1, w2, b2, *, tm_max=None):
    """x: [B, S, d_model] -> [B, S, d_model].

    Weights are stored as [in_features, out_features] (transposed vs PyTorch
    nn.Linear):  out = relu(x @ W1 + b1) @ W2 + b2.
    Pass W1/W2 already in bf16 (see prepare_params) to avoid a per-call cast.
    """
    B, S, d_model = x.shape
    d_ff = w1.shape[1]
    out_dtype = x.dtype
    out_bytes = jnp.dtype(out_dtype).itemsize

    M = B * S
    x2d = x.reshape(M, d_model)

    # Pad rows only to a 16-multiple (bf16 sublane pack), NOT to a full tm tile;
    # the grid uses pl.cdiv so the last row tile may be partial (masked stores).
    M_pad = _round_up(M, 16)
    if M_pad != M:
        x2d = jnp.pad(x2d, ((0, M_pad - M), (0, 0)))

    # Per-generation VMEM budget: ~75% of physical (96 MiB on v5e/v6e, 48 MiB
    # on v7x), with extra headroom left for compiler-internal scratch.
    vmem_cap = _vmem_capacity_bytes()
    vmem_limit = int(vmem_cap * 0.75)
    if tm_max is None:
        tm_max = 1024 if vmem_cap >= 100 * 1024 * 1024 else 512

    tm, tn, tk = _select_tiles(M_pad, d_model, d_ff, out_bytes,
                               int(vmem_limit * 0.85), tm_max)

    n_i = pl.cdiv(M_pad, tm)
    n_j = d_model // tn
    n_k = pl.cdiv(d_ff, tk)
    grid = (n_i, n_j, n_k)

    # bf16 operands, f32 accumulation. Weights should already be bf16 (cast once
    # at prep time); these casts are Python-static no-ops in that case.
    xb = x2d if x2d.dtype == jnp.bfloat16 else x2d.astype(jnp.bfloat16)
    w1b = w1 if w1.dtype == jnp.bfloat16 else w1.astype(jnp.bfloat16)
    w2b = w2 if w2.dtype == jnp.bfloat16 else w2.astype(jnp.bfloat16)
    b1f = jnp.asarray(b1, jnp.float32).reshape(1, d_ff)
    b2f = jnp.asarray(b2, jnp.float32).reshape(1, d_model)

    # Cost estimate accounting for weight re-streaming:
    #   W1 is re-read per (i, j) tile, W2 per i tile; x is resident across j, k.
    flops = 2 * M_pad * d_model * d_ff * n_j + 2 * M_pad * d_ff * d_model
    bytes_accessed = (
        M_pad * d_model * 2                       # x (read once per row tile)
        + n_i * n_j * d_model * d_ff * 2          # W1 streamed per (i, j)
        + n_i * d_ff * d_model * 2                # W2 streamed per i
        + n_i * n_j * d_ff * 4 + n_i * d_model * 4  # biases
        + M_pad * d_model * out_bytes             # output
    )

    out2d = pl.pallas_call(
        _ffn_kernel,
        out_shape=jax.ShapeDtypeStruct((M_pad, d_model), out_dtype),
        grid_spec=pltpu.PrefetchScalarGridSpec(
            num_scalar_prefetch=0,
            grid=grid,
            in_specs=[
                pl.BlockSpec((tm, d_model), lambda i, j, k: (i, 0)),   # x row tile
                pl.BlockSpec((d_model, tk), lambda i, j, k: (0, k)),   # W1 chunk
                pl.BlockSpec((1, tk), lambda i, j, k: (0, k)),         # b1 chunk
                pl.BlockSpec((tk, tn), lambda i, j, k: (k, j)),        # W2 chunk
                pl.BlockSpec((1, tn), lambda i, j, k: (0, j)),         # b2 tile
            ],
            out_specs=pl.BlockSpec((tm, tn), lambda i, j, k: (i, j)),
            scratch_shapes=[pltpu.VMEM((tm, tn), jnp.float32)],
        ),
        compiler_params=pltpu.CompilerParams(
            dimension_semantics=("parallel", "parallel", "arbitrary"),
            vmem_limit_bytes=vmem_limit,
        ),
        cost_estimate=pl.CostEstimate(
            flops=flops, transcendentals=0, bytes_accessed=bytes_accessed),
    )(xb, w1b, b1f, w2b, b2f)

    return out2d[:M].reshape(B, S, d_model)


# --------------------------- parameter helpers --------------------------------


def init_params(key, d_model, d_ff, dtype=jnp.float32):
    """Deterministic init mimicking nn.Linear defaults (uniform +/- 1/sqrt(fan_in)).
    Weights stored as [in_features, out_features] (transposed vs PyTorch)."""
    k1, k2, k3, k4 = jax.random.split(key, 4)
    bnd1 = 1.0 / (d_model ** 0.5)
    bnd2 = 1.0 / (d_ff ** 0.5)
    w1 = jax.random.uniform(k1, (d_model, d_ff), dtype, -bnd1, bnd1)
    b1 = jax.random.uniform(k2, (1, d_ff), dtype, -bnd1, bnd1)
    w2 = jax.random.uniform(k3, (d_ff, d_model), dtype, -bnd2, bnd2)
    b2 = jax.random.uniform(k4, (1, d_model), dtype, -bnd2, bnd2)
    return w1, b1, w2, b2


def prepare_params(w1, b1, w2, b2):
    """One-time cast of weights to bf16 (biases stay f32) so feed_forward does
    not pay an extra f32->bf16 HBM round-trip on every call."""
    return (w1.astype(jnp.bfloat16), jnp.asarray(b1, jnp.float32),
            w2.astype(jnp.bfloat16), jnp.asarray(b2, jnp.float32))


# ------------------------------- demo ----------------------------------------


if __name__ == "__main__":
    B, S, d_model, d_ff = 2, 8, 32, 1024

    key = jax.random.PRNGKey(0)
    kx, kp = jax.random.split(key)
    x = jax.random.normal(kx, (B, S, d_model), jnp.float32)
    w1, b1, w2, b2 = init_params(kp, d_model, d_ff)

    # Cast weights to bf16 ONCE (not per forward call).
    w1b, b1f, w2b, b2f = prepare_params(w1, b1, w2, b2)

    out = feed_forward(x, w1b, b1f, w2b, b2f)
    out = jax.block_until_ready(out)

    # Reference check in plain f32 JAX (kernel runs matmuls in bf16 with f32
    # accumulation, so tolerance is loosened accordingly).
    ref = jnp.maximum(x.reshape(-1, d_model) @ w1 + b1, 0.0) @ w2 + b2
    ref = ref.reshape(B, S, d_model)
    assert out.shape == (B, S, d_model)
    assert jnp.allclose(out, ref, atol=3e-2, rtol=3e-2), (
        float(jnp.max(jnp.abs(out - ref))))

    print("KERNEL_OK")
</pallas_src>

<mosaic_0001>
module attributes {stable_mosaic.version = 11 : i64} {
  func.func @_ffn_kernel(%arg0: i32, %arg1: i32, %arg2: i32, %arg3: memref<16x32xbf16, #tpu.memory_space<vmem>>, %arg4: memref<32x1024xbf16, #tpu.memory_space<vmem>>, %arg5: memref<1x1024xf32, #tpu.memory_space<vmem>>, %arg6: memref<1024x32xbf16, #tpu.memory_space<vmem>>, %arg7: memref<1x32xf32, #tpu.memory_space<vmem>>, %arg8: memref<16x32xf32, #tpu.memory_space<vmem>>, %arg9: memref<16x32xf32, #tpu.memory_space<vmem>>) attributes {dimension_semantics = [#tpu.dimension_semantics<parallel>, #tpu.dimension_semantics<parallel>, #tpu.dimension_semantics<arbitrary>], iteration_bounds = array<i64: 1, 1, 1>, scalar_prefetch = 0 : i64, scratch_operands = 1 : i64, tpu.core_type = #tpu.core_type<tc>, window_params = [{transform_indices = @transform_0, window_bounds = array<i64: 16, 32>}, {transform_indices = @transform_1, window_bounds = array<i64: 32, 1024>}, {transform_indices = @transform_2, window_bounds = array<i64: 1, 1024>}, {transform_indices = @transform_3, window_bounds = array<i64: 1024, 32>}, {transform_indices = @transform_4, window_bounds = array<i64: 1, 32>}, {transform_indices = @transform_5, window_bounds = array<i64: 16, 32>}]} {
    %c0_i32 = arith.constant 0 : i32
    %0 = arith.cmpi eq, %arg2, %c0_i32 : i32
    %1 = arith.extui %0 : i1 to i32
    %c0_i32_0 = arith.constant 0 : i32
    %2 = arith.cmpi ne, %1, %c0_i32_0 : i32
    scf.if %2 {
      %cst_16 = arith.constant 0.000000e+00 : f32
      %20 = vector.broadcast %cst_16 : f32 to vector<16x32xf32>
      %c0_17 = arith.constant 0 : index
      %c0_18 = arith.constant 0 : index
      %21 = vector.load %arg9[%c0_17, %c0_18] : memref<16x32xf32, #tpu.memory_space<vmem>>, vector<16x32xf32>
      tpu.vector_store %arg9[%c0_17, %c0_18], %20 {strides = array<i32>} : memref<16x32xf32, #tpu.memory_space<vmem>>, vector<16x32xf32>,
    } else {
    }
    %c0 = arith.constant 0 : index
    %c0_1 = arith.constant 0 : index
    %3 = vector.load %arg3[%c0, %c0_1] : memref<16x32xbf16, #tpu.memory_space<vmem>>, vector<16x32xbf16>
    %c0_2 = arith.constant 0 : index
    %c0_3 = arith.constant 0 : index
    %4 = vector.load %arg4[%c0_2, %c0_3] : memref<32x1024xbf16, #tpu.memory_space<vmem>>, vector<32x1024xbf16>
    %cst = arith.constant dense<0.000000e+00> : vector<16x1024xf32>
    %5 = tpu.matmul %3, %4, %cst {dimension_numbers = #tpu.dot_dimension_numbers<[1], [0], [0], [1], [0, 0, 1, 1], [], []>} : vector<16x32xbf16>, vector<32x1024xbf16>, vector<16x1024xf32> -> vector<16x1024xf32>
    %c0_4 = arith.constant 0 : index
    %c0_5 = arith.constant 0 : index
    %6 = vector.load %arg5[%c0_4, %c0_5] : memref<1x1024xf32, #tpu.memory_space<vmem>>, vector<1x1024xf32>
    %7 = vector.broadcast %6 : vector<1x1024xf32> to vector<16x1024xf32>
    %8 = arith.addf %5, %7 : vector<16x1024xf32>
    %cst_6 = arith.constant 0.000000e+00 : f32
    %9 = vector.broadcast %cst_6 : f32 to vector<16x1024xf32>
    %10 = arith.maximumf %8, %9 : vector<16x1024xf32>
    %c0_7 = arith.constant 0 : index
    %c0_8 = arith.constant 0 : index
    %11 = vector.load %arg9[%c0_7, %c0_8] : memref<16x32xf32, #tpu.memory_space<vmem>>, vector<16x32xf32>
    %12 = arith.truncf %10 : vector<16x1024xf32> to vector<16x1024xbf16>
    %c0_9 = arith.constant 0 : index
    %c0_10 = arith.constant 0 : index
    %13 = vector.load %arg6[%c0_9, %c0_10] : memref<1024x32xbf16, #tpu.memory_space<vmem>>, vector<1024x32xbf16>
    %cst_11 = arith.constant dense<0.000000e+00> : vector<16x32xf32>
    %14 = tpu.matmul %12, %13, %cst_11 {dimension_numbers = #tpu.dot_dimension_numbers<[1], [0], [0], [1], [0, 0, 1, 1], [], []>} : vector<16x1024xbf16>, vector<1024x32xbf16>, vector<16x32xf32> -> vector<16x32xf32>
    %15 = arith.addf %11, %14 : vector<16x32xf32>
    %c0_12 = arith.constant 0 : index
    %c0_13 = arith.constant 0 : index
    %16 = vector.load %arg9[%c0_12, %c0_13] : memref<16x32xf32, #tpu.memory_space<vmem>>, vector<16x32xf32>
    tpu.vector_store %arg9[%c0_12, %c0_13], %15 {strides = array<i32>} : memref<16x32xf32, #tpu.memory_space<vmem>>, vector<16x32xf32>,
    %c0_i32_14 = arith.constant 0 : i32
    %17 = arith.cmpi eq, %arg2, %c0_i32_14 : i32
    %18 = arith.extui %17 : i1 to i32
    %c0_i32_15 = arith.constant 0 : i32
    %19 = arith.cmpi ne, %18, %c0_i32_15 : i32
    scf.if %19 {
      %c0_16 = arith.constant 0 : index
      %c0_17 = arith.constant 0 : index
      %20 = vector.load %arg9[%c0_16, %c0_17] : memref<16x32xf32, #tpu.memory_space<vmem>>, vector<16x32xf32>
      %c0_18 = arith.constant 0 : index
      %c0_19 = arith.constant 0 : index
      %21 = vector.load %arg7[%c0_18, %c0_19] : memref<1x32xf32, #tpu.memory_space<vmem>>, vector<1x32xf32>
      %22 = vector.broadcast %21 : vector<1x32xf32> to vector<16x32xf32>
      %23 = arith.addf %20, %22 : vector<16x32xf32>
      %c0_20 = arith.constant 0 : index
      %c0_21 = arith.constant 0 : index
      %24 = vector.load %arg8[%c0_20, %c0_21] : memref<16x32xf32, #tpu.memory_space<vmem>>, vector<16x32xf32>
      tpu.vector_store %arg8[%c0_20, %c0_21], %23 {strides = array<i32>} : memref<16x32xf32, #tpu.memory_space<vmem>>, vector<16x32xf32>,
    } else {
    }
    return
  }
  func.func @transform_0(%arg0: i32, %arg1: i32, %arg2: i32) -> (i32, i32) {
    %c0_i32 = arith.constant 0 : i32
    %c0_i32_0 = arith.constant 0 : i32
    return %arg0, %c0_i32 : i32, i32
  }
  func.func @transform_1(%arg0: i32, %arg1: i32, %arg2: i32) -> (i32, i32) {
    %c0_i32 = arith.constant 0 : i32
    %c0_i32_0 = arith.constant 0 : i32
    return %c0_i32, %arg2 : i32, i32
  }
  func.func @transform_2(%arg0: i32, %arg1: i32, %arg2: i32) -> (i32, i32) {
    %c0_i32 = arith.constant 0 : i32
    %c0_i32_0 = arith.constant 0 : i32
    return %c0_i32, %arg2 : i32, i32
  }
  func.func @transform_3(%arg0: i32, %arg1: i32, %arg2: i32) -> (i32, i32) {
    %c0_i32 = arith.constant 0 : i32
    return %arg2, %arg1 : i32, i32
  }
  func.func @transform_4(%arg0: i32, %arg1: i32, %arg2: i32) -> (i32, i32) {
    %c0_i32 = arith.constant 0 : i32
    %c0_i32_0 = arith.constant 0 : i32
    return %c0_i32, %arg1 : i32, i32
  }
  func.func @transform_5(%arg0: i32, %arg1: i32, %arg2: i32) -> (i32, i32) {
    %c0_i32 = arith.constant 0 : i32
    return %arg0, %arg1 : i32, i32
  }
}

</mosaic_0001>

<bundles_post_ra>
// kernel: tpu_custom_call.1
= control target key start
LH: loop header
LB: loop body
LE: loop exit
PB: predicated region body
PF: predicated region fallthrough
CT: control target
= control target key end

     0   :  { %v1354_v8 = vmov 0   ;;  %vm26_vm0 = vcmask 261120   ;;  %s1683_s0 = inlined_call_operand.vmem [shape: bf16[16,32], index: 0, kind: input, shape index: {}]   ;;  %s1684_s1 = inlined_call_operand.vmem [shape: bf16[32,1024], index: 1, kind: input, shape index: {}]   ;;  %s1685_s2 = inlined_call_operand.vmem [shape: f32[1,1024], index: 2, kind: input, shape index: {}]   ;;  %s1686_s3 = inlined_call_operand.vmem [shape: bf16[1024,32], index: 3, kind: input, shape index: {}]   ;;  %s1687_s4 = inlined_call_operand.vmem [shape: f32[1,32], index: 4, kind: input, shape index: {}]   ;;  %s1688_s5 = inlined_call_operand.hbm [shape: f32[16,32], index: 5, kind: output, shape index: {}]  }
   0x1   :  { %v39_v0 = vld [vmem:[%s1684_s1 + $0x40] sm:$0xff]  ;;  %v40_v2 = vld [vmem:[%s1684_s1 + $0x48] sm:$0xff]  ;;  %210 = vmatprep.mubr.bf16.mxu0 %v1354_v8  ;;  %253 = vmatprep.mubr.bf16.mxu1 %v1354_v8  ;;  %v41_v15 = vld [vmem:[%s1684_s1 + $0x50] sm:$0xff] }
   0x2   :  { %v43_v1 = vld [vmem:[%s1684_s1 + $0x60] sm:$0xff]  ;;  %v44_v4 = vld [vmem:[%s1684_s1 + $0x68] sm:$0xff]  ;;  %v45_v17 = vld [vmem:[%s1684_s1 + $0x70] sm:$0xff] }
   0x3   :  { %v1098_v3 = vcombine.high %v39_v0, %v43_v1  ;;  %v1097_v5 = vcombine.low %v39_v0, %v43_v1  ;;  %v31_v6 = vld [vmem:[%s1684_s1] sm:$0xff]  ;;  %v1100_v9 = vcombine.high %v40_v2, %v44_v4  ;;  %v1099_v10 = vcombine.low %v40_v2, %v44_v4  ;;  %v32_v12 = vld [vmem:[%s1684_s1 + $0x8] sm:$0xff]  ;;  %v42_v18 = vld [vmem:[%s1684_s1 + $0x58] sm:$0xff] }
   0x4   :  { %v35_v7 = vld [vmem:[%s1684_s1 + $0x20] sm:$0xff]  ;;  %v36_v13 = vld [vmem:[%s1684_s1 + $0x28] sm:$0xff]  ;;  %v46_v19 = vld [vmem:[%s1684_s1 + $0x78] sm:$0xff]  ;;  %v1102_v22 = vcombine.high %v41_v15, %v45_v17  ;;  %v1101_v28 = vcombine.low %v41_v15, %v45_v17 }
   0x5   :  { %v1090_v11 = vcombine.high %v31_v6, %v35_v7  ;;  %190 = vmatprep.subr.bf16.mxu0 %v1098_v3  ;;  %v1092_v14 = vcombine.high %v32_v12, %v36_v13  ;;  %233 = vmatprep.subr.bf16.mxu1 %v1100_v9  ;;  %v1089_v16 = vcombine.low %v31_v6, %v35_v7  ;;  %v1267_v21 = vld [vmem:[%s1683_s0] sm:$0xff]   ;;  %v33_v23 = vld [vmem:[%s1684_s1 + $0x10] sm:$0xff]  ;;  %v34_v26 = vld [vmem:[%s1684_s1 + $0x18] sm:$0xff] }
   0x6   :  { %191 = vmatpush1.bf16.msra.mxu0 %v1097_v5  ;;  %234 = vmatpush1.bf16.msra.mxu1 %v1099_v10  ;;  %v1091_v20 = vcombine.low %v32_v12, %v36_v13  ;;  %v37_v24 = vld [vmem:[%s1684_s1 + $0x30] sm:$0xff]  ;;  %v1104_v25 = vcombine.high %v42_v18, %v46_v19  ;;  %v38_v27 = vld [vmem:[%s1684_s1 + $0x38] sm:$0xff]  ;;  %v1103_v29 = vcombine.low %v42_v18, %v46_v19  ;;  %v1276_v42 = vld [vmem:[%s1686_s3 + $0x68] sm:$0xff]  }
   0x7   :  { %192 = vmatprep.subr.bf16.mxu0 %v1090_v11  ;;  %235 = vmatprep.subr.bf16.mxu1 %v1092_v14  ;;  %v1094_v30 = vcombine.high %v33_v23, %v37_v24  ;;  %v1096_v31 = vcombine.high %v34_v26, %v38_v27  ;;  %v1093_v32 = vcombine.low %v33_v23, %v37_v24  ;;  %v1268_v34 = vld [vmem:[%s1686_s3 + $0x78] sm:$0xff]   ;;  %v1272_v38 = vld [vmem:[%s1686_s3 + $0x70] sm:$0xff]   ;;  %v1277_v43 = vld [vmem:[%s1686_s3 + $0xe8] sm:$0xff]  }
   0x8   :  { %v1095_v33 = vcombine.low %v34_v26, %v38_v27  ;;  %v1269_v35 = vld [vmem:[%s1686_s3 + $0xf8] sm:$0xff]   ;;  %v1273_v39 = vld [vmem:[%s1686_s3 + $0xf0] sm:$0xff]   ;;  %v1278_v44 = vld [vmem:[%s1686_s3 + $0x28] sm:$0xff]  }
   0x9   :  { %v1270_v36 = vld [vmem:[%s1686_s3 + $0x38] sm:$0xff]   ;;  %v1274_v40 = vld [vmem:[%s1686_s3 + $0x30] sm:$0xff]   ;;  %v1279_v45 = vld [vmem:[%s1686_s3 + $0xa8] sm:$0xff]  }
   0xa   :  { %193 = vmatpush1.bf16.msra.mxu0 %v1089_v16  ;;  %236 = vmatpush1.bf16.msra.mxu1 %v1091_v20  ;;  %v1271_v37 = vld [vmem:[%s1686_s3 + $0xb8] sm:$0xff]   ;;  %v1275_v41 = vld [vmem:[%s1686_s3 + $0xb0] sm:$0xff]   ;;  %v1280_v46 = vld [vmem:[%s1686_s3 + $0x60] sm:$0xff]  }
   0xb   :  { %276 = vmatprep.subr.bf16.mxu0 %v1102_v22  ;;  %319 = vmatprep.subr.bf16.mxu1 %v1104_v25  ;;  %v1281_v47 = vld [vmem:[%s1686_s3 + $0xe0] sm:$0xff]   ;;  %v1284_v50 = vld [vmem:[%s1686_s3 + $0x58] sm:$0xff]  }
   0xc   :  { %v1282_v48 = vld [vmem:[%s1686_s3 + $0x20] sm:$0xff]   ;;  %v1285_v51 = vld [vmem:[%s1686_s3 + $0xd8] sm:$0xff]  }
   0xd   :  { %1105 = vmatmul.mubr.msk.bf16.vlgmr.msra.gmra.mxu0 %vm26_vm0, %v1267_v21  ;;  %1106 = vmatmul.mubr.msk.bf16.vlgmr.msra.gmra.mxu1 %vm26_vm0, %v1267_v21  ;;  %v1283_v49 = vld [vmem:[%s1686_s3 + $0xa0] sm:$0xff]   ;;  %v1286_v52 = vld [vmem:[%s1686_s3 + $0x18] sm:$0xff]  }
   0xe   :  { %277 = vmatpush1.bf16.msra.mxu0 %v1101_v28  ;;  %320 = vmatpush1.bf16.msra.mxu1 %v1103_v29  ;;  %v1287_v53 = vld [vmem:[%s1686_s3 + $0x98] sm:$0xff]  }
   0xf   :  { %278 = vmatprep.subr.bf16.mxu0 %v1094_v30  ;;  %321 = vmatprep.subr.bf16.mxu1 %v1096_v31 }
  0x10   :  { %296 = vmatprep.mubr.bf16.mxu0 %v1354_v8  ;;  %339 = vmatprep.mubr.bf16.mxu1 %v1354_v8 }
  0x12   :  { %279 = vmatpush1.bf16.msra.mxu0 %v1093_v32  ;;  %322 = vmatpush1.bf16.msra.mxu1 %v1095_v33 }
  0x13   :  { %1174 = vmatprep.subr.bf16.mxu0 %v1268_v34  ;;  %1196 = vmatprep.subr.bf16.mxu1 %v1269_v35 }
  0x15   :  { %1107 = vmatmul.mubr.msk.bf16.vlgmr.msra.gmra.mxu0 %vm26_vm0, %v1267_v21  ;;  %1108 = vmatmul.mubr.msk.bf16.vlgmr.msra.gmra.mxu1 %vm26_vm0, %v1267_v21 }
  0x16   :  { %1175 = vmatpush3.bf16.msra.mxu0 %v1270_v36  ;;  %1197 = vmatpush3.bf16.msra.mxu1 %v1271_v37 }
  0x17   :  { %1176 = vmatprep.subr.bf16.mxu0 %v1272_v38  ;;  %1198 = vmatprep.subr.bf16.mxu1 %v1273_v39 }
  0x1a   :  { %1177 = vmatpush3.bf16.msra.mxu0 %v1274_v40  ;;  %1199 = vmatpush3.bf16.msra.mxu1 %v1275_v41 }
  0x1b   :  { %1178 = vmatprep.subr.bf16.mxu0 %v1276_v42  ;;  %1200 = vmatprep.subr.bf16.mxu1 %v1277_v43 }
  0x1e   :  { %1179 = vmatpush3.bf16.msra.mxu0 %v1278_v44  ;;  %1201 = vmatpush3.bf16.msra.mxu1 %v1279_v45 }
  0x1f   :  { %1180 = vmatprep.subr.bf16.mxu0 %v1280_v46  ;;  %1202 = vmatprep.subr.bf16.mxu1 %v1281_v47 }
  0x22   :  { %1181 = vmatpush3.bf16.msra.mxu0 %v1282_v48  ;;  %1203 = vmatpush3.bf16.msra.mxu1 %v1283_v49 }
  0x23   :  { %1182 = vmatprep.subr.bf16.mxu0 %v1284_v50  ;;  %1204 = vmatprep.subr.bf16.mxu1 %v1285_v51 }
  0x26   :  { %1183 = vmatpush3.bf16.msra.mxu0 %v1286_v52  ;;  %1205 = vmatpush3.bf16.msra.mxu1 %v1287_v53 }
  0x27   :  { %10 = vsyncpa [#allocation4], 0  ;;  %v1288_v54 = vld [vmem:[%s1686_s3 + $0x50] sm:$0xff]   ;;  %v1292_v58 = vld [vmem:[%s1686_s3 + $0x48] sm:$0xff]   ;;  %v49_v4 = vlaneseq  ;;  %s1356_s20 = smov [#allocation3]  }
  0x28   :  { %v1289_v55 = vld [vmem:[%s1686_s3 + $0xd0] sm:$0xff]   ;;  %1184 = vmatprep.subr.bf16.mxu0 %v1288_v54  ;;  %v1293_v59 = vld [vmem:[%s1686_s3 + $0xc8] sm:$0xff]   ;;  %v1296_v62 = vld [vmem:[%s1686_s3 + $0x40] sm:$0xff]   ;;  %s1077_s21 = sshll.u32 %s1356_s20, 4  ;;  %s1078_s21 = int_to_ptr.vmem [resolvable:$true] %s1077_s21 }
  0x29   :  { %v1290_v56 = vld [vmem:[%s1686_s3 + $0x10] sm:$0xff]   ;;  %1206 = vmatprep.subr.bf16.mxu1 %v1289_v55  ;;  %v1294_v60 = vld [vmem:[%s1686_s3 + $0x8] sm:$0xff]   ;;  %v1297_v63 = vld [vmem:[%s1686_s3 + $0xc0] sm:$0xff]   ;;  %v1546_v5 = vshrl.u32 %v49_v4, 7  ;;  %s1332_s22 = scalar_lea.vmem %s1078_s21, 256  ;;  %p1337_p1 = scmp.lt.s32.totalorder %s1078_s21, %s1078_s21 }
  0x2a   :  { %v1291_v57 = vld [vmem:[%s1686_s3 + $0x90] sm:$0xff]   ;;  %1185 = vmatpush3.bf16.msra.mxu0 %v1290_v56  ;;  %v1295_v61 = vld [vmem:[%s1686_s3 + $0x88] sm:$0xff]   ;;  %v1298_v0 = vld [vmem:[%s1686_s3] sm:$0xff]   ;;  %p1333_p0 = scmp.ne.s32.totalorder %s1078_s21, %s1332_s22  ;;  %p1338_p2 = scmp.lt.s32.totalorder %s1332_s22, %s1332_s22 }
  0x2b   :  { %1207 = vmatpush3.bf16.msra.mxu1 %v1291_v57  ;;  %1186 = vmatprep.subr.bf16.mxu0 %v1292_v58  ;;  %v1299_v1 = vld [vmem:[%s1686_s3 + $0x80] sm:$0xff]   ;;  %v1300_v2 = vld [vmem:[%s1686_s3 + $0x178] sm:$0xff]   ;;  %v55_v6 = vsub.s32 1, %v1546_v5  ;;  %v51_v7 = vsub.s32 0, %v1546_v5  ;;  %v63_v8 = vsub.s32 3, %v1546_v5  ;;  %v59_v10 = vsub.s32 2, %v1546_v5 }
  0x2c   :  { %1208 = vmatprep.subr.bf16.mxu1 %v1293_v59  ;;  %v1301_v3 = vld [vmem:[%s1686_s3 + $0x1f8] sm:$0xff]   ;;  %v1554_v9 = vld [vmem:[%s1685_s2] sm:$0xff]  ;;  %v71_v19 = vsub.s32 5, %v1546_v5  ;;  %v79_v21 = vsub.s32 7, %v1546_v5  ;;  %v1304_v53 = vld [vmem:[%s1686_s3 + $0x170] sm:$0xff]   ;;  %p1339_p3 = por %p1338_p2, %p1337_p1 }
  0x2d   :  { %v56_v13 = vrot.slane %v1554_v9, %v55_v6  ;;  %v52_v14 = vrot.slane %v1554_v9, %v51_v7  ;;  %v64_v16 = vrot.slane %v1554_v9, %v63_v8  ;;  %v60_v17 = vrot.slane %v1554_v9, %v59_v10  ;;  %v1302_v47 = vld [vmem:[%s1686_s3 + $0x138] sm:$0xff]   ;;  %v1305_v57 = vld [vmem:[%s1686_s3 + $0x1f0] sm:$0xff]   ;;  %v1309_v4 = vld [vmem:[%s1686_s3 + $0x1e8] sm:$0xff]  }
  0x2e   :  { %1187 = vmatpush3.bf16.msra.mxu0 %v1294_v60  ;;  %v72_v32 = vrot.slane %v1554_v9, %v71_v19  ;;  %v80_v36 = vrot.slane %v1554_v9, %v79_v21  ;;  %v1303_v52 = vld [vmem:[%s1686_s3 + $0x1b8] sm:$0xff]   ;;  %v1306_v60 = vld [vmem:[%s1686_s3 + $0x130] sm:$0xff]   ;;  %v1310_v8 = vld [vmem:[%s1686_s3 + $0x128] sm:$0xff]   ;;  %p1340_p4 = pnand %p1339_p3, %p1333_p0 }
  0x2f   :  { %1209 = vmatpush3.bf16.msra.mxu1 %v1295_v61  ;;  %1188 = vmatprep.subr.bf16.mxu0 %v1296_v62  ;;  %v1318_v19 = vld [vmem:[%s1686_s3 + $0x118] sm:$0xff]  }
  0x30   :  { %1210 = vmatprep.subr.bf16.mxu1 %v1297_v63  ;;  %v1319_v21 = vld [vmem:[%s1686_s3 + $0x198] sm:$0xff]  }
  0x32   :  { %1189 = vmatpush3.bf16.msra.mxu0 %v1298_v0  ;;  %v1307_v0 = vld [vmem:[%s1686_s3 + $0x1b0] sm:$0xff]  }
  0x33   :  { %1211 = vmatpush3.bf16.msra.mxu1 %v1299_v1  ;;  %1218 = vmatprep.subr.bf16.mxu0 %v1300_v2  ;;  %v1308_v1 = vld [vmem:[%s1686_s3 + $0x168] sm:$0xff]  }
  0x34   :  { %1240 = vmatprep.subr.bf16.mxu1 %v1301_v3 }
  0xcd   :  { %v212_v11 = vpop.f32.mrf.mxu0  ;;  %v255_v12 = vpop.f32.mrf.mxu1 }
  0xce   :  { %v213_v25 = vadd.f32 %v212_v11, %v52_v14  ;;  %v256_v29 = vadd.f32 %v255_v12, %v60_v17  ;;  %v1311_v11 = vld [vmem:[%s1686_s3 + $0x1a8] sm:$0xff]   ;;  %v1312_v12 = vld [vmem:[%s1686_s3 + $0x160] sm:$0xff]  }
  0xcf   :  { %v214_v15 = vpop.f32.mrf.mxu0  ;;  %v257_v18 = vpop.f32.mrf.mxu1 }
  0xd0   :  { %v215_v22 = vadd.f32 %v214_v15, %v56_v13  ;;  %v258_v26 = vadd.f32 %v257_v18, %v64_v16  ;;  %v350_v41 = vmax.f32 %v213_v25, 0.0  ;;  %v352_v45 = vmax.f32 %v256_v29, 0.0  ;;  %v1314_v15 = vld [vmem:[%s1686_s3 + $0x120] sm:$0xff]   ;;  %v1317_v18 = vld [vmem:[%s1686_s3 + $0x1d8] sm:$0xff]   ;;  %v1322_v25 = vld [vmem:[%s1686_s3 + $0x110] sm:$0xff]  }
  0xd1   :  { %v216_v20 = vpop.f32.mrf.mxu0  ;;  %v259_v24 = vpop.f32.mrf.mxu1  ;;  %v1325_v29 = vld [vmem:[%s1686_s3 + $0x1c8] sm:$0xff]  }
  0xd2   :  { %v217_v23 = vadd.f32 %v216_v20, %v52_v14  ;;  %v260_v27 = vadd.f32 %v259_v24, %v60_v17  ;;  %v351_v37 = vmax.f32 %v215_v22, 0.0  ;;  %v353_v42 = vmax.f32 %v258_v26, 0.0  ;;  %v1313_v14 = vld [vmem:[%s1686_s3 + $0x1e0] sm:$0xff]   ;;  %v1316_v17 = vld [vmem:[%s1686_s3 + $0x158] sm:$0xff]   ;;  %v1320_v22 = vld [vmem:[%s1686_s3 + $0x150] sm:$0xff]  }
  0xd3   :  { %v218_v28 = vpop.f32.mrf.mxu0  ;;  %v261_v31 = vpop.f32.mrf.mxu1  ;;  %v67_v20 = vsub.s32 4, %v1546_v5  ;;  %v1321_v24 = vld [vmem:[%s1686_s3 + $0x1d0] sm:$0xff]  }
  0xd4   :  { %v219_v30 = vadd.f32 %v218_v28, %v56_v13  ;;  %v358_v33 = vmax.f32 %v217_v23, 0.0  ;;  %v262_v34 = vadd.f32 %v261_v31, %v64_v16  ;;  %v360_v38 = vmax.f32 %v260_v27, 0.0  ;;  %v1315_v16 = vld [vmem:[%s1686_s3 + $0x1a0] sm:$0xff]   ;;  %v1323_v27 = vld [vmem:[%s1686_s3 + $0x190] sm:$0xff]  }
  0xd5   :  { %v1564_v35 = vpop.f32.mrf.mxu0  ;;  %v1567_v40 = vpop.f32.mrf.mxu1  ;;  %v75_v23 = vsub.s32 6, %v1546_v5  ;;  %v68_v26 = vrot.slane %v1554_v9, %v67_v20  ;;  %v1324_v5 = vld [vmem:[%s1686_s3 + $0x148] sm:$0xff]  }
  0xd6   :  { %v359_v39 = vmax.f32 %v219_v30, 0.0  ;;  %v361_v43 = vmax.f32 %v262_v34, 0.0  ;;  %v368_v50 = vpack.c.bf16 %v358_v33, %v350_v41  ;;  %v370_v56 = vpack.c.bf16 %v360_v38, %v352_v45  ;;  %v1326_v30 = vld [vmem:[%s1686_s3 + $0x108] sm:$0xff]   ;;  %v1328_v33 = vld [vmem:[%s1686_s3 + $0x140] sm:$0xff]  }
  0xd7   :  { %v300_v44 = vpop.f32.mrf.mxu0  ;;  %v343_v49 = vpop.f32.mrf.mxu1  ;;  %v76_v28 = vrot.slane %v1554_v9, %v75_v23  ;;  %v299_v31 = vadd.f32 %v1564_v35, %v68_v26  ;;  %v1327_v9 = vld [vmem:[%s1686_s3 + $0x188] sm:$0xff]   ;;  %v1329_v35 = vld [vmem:[%s1686_s3 + $0x1c0] sm:$0xff]   ;;  %v1355_v45 = vmov 0.0  }
  0xd8   :  { %v369_v46 = vpack.c.bf16 %v359_v39, %v351_v37  ;;  %v301_v48 = vadd.f32 %v300_v44, %v72_v32  ;;  %v371_v51 = vpack.c.bf16 %v361_v43, %v353_v42  ;;  %v344_v55 = vadd.f32 %v343_v49, %v80_v36  ;;  %v1330_v37 = vld [vmem:[%s1686_s3 + $0x100] sm:$0xff]   ;;  %27 = vst.msk [vmem:[#allocation2] sm:$0xff] %vm26_vm0, %v1355_v45 }
  0xd9   :  { %v1578_v54 = vpop.f32.mrf.mxu0  ;;  %v1583_v58 = vpop.f32.mrf.mxu1  ;;  %v342_v34 = vadd.f32 %v1567_v40, %v76_v28  ;;  %v354_v38 = vmax.f32 %v299_v31, 0.0  ;;  %v1331_v40 = vld [vmem:[%s1686_s3 + $0x180] sm:$0xff]   ;;  %28 = vst.msk [vmem:[#allocation2 + $0x8] sm:$0xff] %vm26_vm0, %v1355_v45 }
  0xda   :  { %920 = vmatprep.mubr.bf16.mxu0 %v369_v46  ;;  %961 = vmatprep.mubr.bf16.mxu1 %v371_v51  ;;  %v355_v61 = vmax.f32 %v301_v48, 0.0  ;;  %v357_v2 = vmax.f32 %v344_v55, 0.0 }
  0xdb   :  { %921 = vmatmul.mubr.bf16.vlgmr.msra.gmra.mxu0 %v368_v50  ;;  %v304_v59 = vpop.f32.mrf.mxu0  ;;  %962 = vmatmul.mubr.bf16.vlgmr.msra.gmra.mxu1 %v370_v56  ;;  %v347_v63 = vpop.f32.mrf.mxu1  ;;  %v356_v41 = vmax.f32 %v342_v34, 0.0 }
  0xdc   :  { %1219 = vmatpush3.bf16.msra.mxu0 %v1302_v47  ;;  %v305_v62 = vadd.f32 %v304_v59, %v72_v32  ;;  %1241 = vmatpush3.bf16.msra.mxu1 %v1303_v52  ;;  %v348_v3 = vadd.f32 %v347_v63, %v80_v36  ;;  %v303_v32 = vadd.f32 %v1578_v54, %v68_v26 }
  0xdd   :  { %1220 = vmatprep.subr.bf16.mxu0 %v1304_v53  ;;  %1242 = vmatprep.subr.bf16.mxu1 %v1305_v57  ;;  %v346_v36 = vadd.f32 %v1583_v58, %v76_v28 }
  0xde   :  { %v363_v6 = vmax.f32 %v305_v62, 0.0  ;;  %v365_v7 = vmax.f32 %v348_v3, 0.0  ;;  %v362_v39 = vmax.f32 %v303_v32, 0.0 }
  0xdf   :  { %v364_v42 = vmax.f32 %v346_v36, 0.0 }
  0xe0   :  { %1221 = vmatpush3.bf16.msra.mxu0 %v1306_v60  ;;  %v373_v10 = vpack.c.bf16 %v363_v6, %v355_v61  ;;  %1243 = vmatpush3.bf16.msra.mxu1 %v1307_v0  ;;  %v375_v13 = vpack.c.bf16 %v365_v7, %v357_v2  ;;  %v372_v43 = vpack.c.bf16 %v362_v39, %v354_v38 }
  0xe1   :  { %1222 = vmatprep.subr.bf16.mxu0 %v1308_v1  ;;  %1244 = vmatprep.subr.bf16.mxu1 %v1309_v4  ;;  %v374_v44 = vpack.c.bf16 %v364_v42, %v356_v41  ;;  %v366_v4 = vld [vmem:[#allocation2] sm:$0xff] }
  0xe2   :  { %1002 = vmatprep.mubr.bf16.mxu0 %v373_v10  ;;  %1043 = vmatprep.mubr.bf16.mxu1 %v375_v13 }
  0xe4   :  { %1223 = vmatpush3.bf16.msra.mxu0 %v1310_v8  ;;  %1245 = vmatpush3.bf16.msra.mxu1 %v1311_v11 }
  0xe5   :  { %1224 = vmatprep.subr.bf16.mxu0 %v1312_v12  ;;  %1246 = vmatprep.subr.bf16.mxu1 %v1313_v14 }
  0xe8   :  { %1225 = vmatpush3.bf16.msra.mxu0 %v1314_v15  ;;  %1247 = vmatpush3.bf16.msra.mxu1 %v1315_v16  ;;  %v367_v15 = vld [vmem:[#allocation2 + $0x8] sm:$0xff] }
  0xe9   :  { %1226 = vmatprep.subr.bf16.mxu0 %v1316_v17  ;;  %1248 = vmatprep.subr.bf16.mxu1 %v1317_v18  ;;  %v1173_v18 = vld [vmem:[%s1687_s4] ss:$0 sm:$0xff] }
  0xec   :  { %1227 = vmatpush3.bf16.msra.mxu0 %v1318_v19  ;;  %1249 = vmatpush3.bf16.msra.mxu1 %v1319_v21 }
  0xed   :  { %1228 = vmatprep.subr.bf16.mxu0 %v1320_v22  ;;  %1250 = vmatprep.subr.bf16.mxu1 %v1321_v24 }
  0xf0   :  { %1229 = vmatpush3.bf16.msra.mxu0 %v1322_v25  ;;  %1251 = vmatpush3.bf16.msra.mxu1 %v1323_v27 }
  0xf1   :  { %1230 = vmatprep.subr.bf16.mxu0 %v1324_v5  ;;  %1252 = vmatprep.subr.bf16.mxu1 %v1325_v29 }
  0xf4   :  { %1231 = vmatpush3.bf16.msra.mxu0 %v1326_v30  ;;  %1253 = vmatpush3.bf16.msra.mxu1 %v1327_v9 }
  0xf5   :  { %1232 = vmatprep.subr.bf16.mxu0 %v1328_v33  ;;  %1254 = vmatprep.subr.bf16.mxu1 %v1329_v35 }
  0xf8   :  { %1233 = vmatpush3.bf16.msra.mxu0 %v1330_v37  ;;  %1255 = vmatpush3.bf16.msra.mxu1 %v1331_v40 }
  0xfb   :  { %1003 = vmatmul.mubr.bf16.vlgmr.msra.gmra.mxu0 %v372_v43  ;;  %1044 = vmatmul.mubr.bf16.vlgmr.msra.gmra.mxu1 %v374_v44 }
 0x19b   :  { %v1190_v46 = vpop.f32.mrf.mxu0  ;;  %v1212_v47 = vpop.f32.mrf.mxu1 }
 0x19d   :  { %v1191_v48 = vpop.f32.mrf.mxu0  ;;  %v1213_v49 = vpop.f32.mrf.mxu1 }
 0x19e   :  { %v1192_v53 = vadd.f32 %v1191_v48, %v1190_v46  ;;  %v1214_v54 = vadd.f32 %v1213_v49, %v1212_v47 }
 0x19f   :  { %v1193_v50 = vpop.f32.mrf.mxu0  ;;  %v1215_v51 = vpop.f32.mrf.mxu1 }
 0x1a0   :  { %v964_v59 = vadd.f32 %v1214_v54, %v1192_v53 }
 0x1a1   :  { %v1194_v52 = vpop.f32.mrf.mxu0  ;;  %v1216_v55 = vpop.f32.mrf.mxu1 }
 0x1a2   :  { %v1195_v60 = vadd.f32 %v1194_v52, %v1193_v50  ;;  %v1217_v61 = vadd.f32 %v1216_v55, %v1215_v51 }
 0x1a4   :  { %v967_v7 = vadd.f32 %v1217_v61, %v1195_v60 }
 0x1bb   :  { %v1234_v56 = vpop.f32.mrf.mxu0  ;;  %v1256_v57 = vpop.f32.mrf.mxu1 }
 0x1bd   :  { %v1235_v58 = vpop.f32.mrf.mxu0  ;;  %v1257_v63 = vpop.f32.mrf.mxu1 }
 0x1be   :  { %v1236_v62 = vadd.f32 %v1235_v58, %v1234_v56  ;;  %v1258_v2 = vadd.f32 %v1257_v63, %v1256_v57 }
 0x1bf   :  { %v1237_v0 = vpop.f32.mrf.mxu0  ;;  %v1259_v3 = vpop.f32.mrf.mxu1 }
 0x1c0   :  { %v1005_v1 = vadd.f32 %v1236_v62, %v964_v59 }
 0x1c1   :  { %v1238_v6 = vpop.f32.mrf.mxu0  ;;  %v1260_v11 = vpop.f32.mrf.mxu1 }
 0x1c2   :  { %v1046_v8 = vadd.f32 %v1258_v2, %v1005_v1  ;;  %v1239_v10 = vadd.f32 %v1238_v6, %v1237_v0  ;;  %v1261_v14 = vadd.f32 %v1260_v11, %v1259_v3 }
 0x1c4   :  { %v1052_v12 = vadd.f32 %v1046_v8, %v366_v4  ;;  %v1008_v13 = vadd.f32 %v1239_v10, %v967_v7 }
 0x1c6   :  { %1054 = vst.msk [vmem:[#allocation2] sm:$0xff] %vm26_vm0, %v1052_v12  ;;  %v1049_v16 = vadd.f32 %v1261_v14, %v1008_v13 }
 0x1c8   :  { %v1053_v17 = vadd.f32 %v1049_v16, %v367_v15 }
 0x1ca   :  { %1055 = vst.msk [vmem:[#allocation2 + $0x8] sm:$0xff] %vm26_vm0, %v1053_v17 }
 0x1cd   :  { %v1059_v19 = vld [vmem:[#allocation2] sm:$0xff] }
 0x1ce   :  { %v1068_v20 = vadd.f32 %v1173_v18, %v1059_v19 }
 0x1d0   :  { %1070 = vst.msk [vmem:[#allocation3] sm:$0xff] %vm26_vm0, %v1068_v20 }
 0x1d1   :  { %v1060_v21 = vld [vmem:[#allocation2 + $0x8] sm:$0xff] }
 0x1d2   :  { %v1069_v22 = vadd.f32 %v1173_v18, %v1060_v21 }
 0x1d4   :  { %1071 = vst.msk [vmem:[#allocation3 + $0x8] sm:$0xff] %vm26_vm0, %v1069_v22 }
 0x1d5   :  { %1343 = shalt.err (!%p1340_p4)
}
 0x1d6   :  { %s1357_s23 = smov 128   ;;  %s1358_s4 = smov 8  }
 0x1d7   :  { %1083 = dma.vmem_to_hbm [thread:$0]  %s1078_s21, 256, %s1688_s5, [#allocation4], %s1357_s23, %s1357_s23, %s1358_s4  }
 0x1d8   :  { %1352 = dma.done.wait [#allocation4], 256  }
 0x1d9   :  { %1353 = vsyncadd [#allocation4], 4294967040 }
 0x1da   :  { %1087 = vsyncpa [#allocation4], 1 }

</bundles_post_ra>
